<compile_context>
chip_gen: v6e
topology: v6e:2x2x1
jax: 0.10.0
libtpu: 0.0.40
codegen_flags: <defaults>
</compile_context>

<pallas_src>
import functools

import jax
import jax.numpy as jnp
from jax.experimental import pallas as pl
from jax.experimental.pallas import tpu as pltpu


# ----------------------------------------------------------------------------
# fused kernel: outer product + sin/cos, two lane-aligned half stores per tile
# ----------------------------------------------------------------------------
def _pos_emb_kernel(pos_ref, inv_ref, out_ref, *, half):
    # pos_ref: (tm, 1) f32, inv_ref: (1, half) f32 -> VPU broadcast multiply.
    sinusoid = pos_ref[...] * inv_ref[...]                    # (tm, half) f32
    # sin/cos go to the EUP; each half is written straight into its lane
    # range of the (tm, demb) output block (no concatenate temporary).
    out_ref[:, :half] = jnp.sin(sinusoid).astype(out_ref.dtype)
    out_ref[:, half:] = jnp.cos(sinusoid).astype(out_ref.dtype)


def _round_up(x, m):
    return (x + m - 1) // m * m


def _select_row_tile(klen, demb, out_dtype, row_tile):
    """Pick a row tile: big enough to amortize per-step overhead, small enough
    for every generation's VMEM, and (on v7x) never collapsing to grid=(1,)
    for non-trivial klen."""
    itemsize = jnp.dtype(out_dtype).itemsize
    row_align = 16 if itemsize < 4 else 8        # bf16 packs 2 rows / sublane
    if klen <= row_align:
        return klen                              # single full-array block
    # VMEM guard: double-buffered output tile <= ~16 MiB (safe on v5e/v6e's
    # 128 MiB and within v7x's 32 MiB scoped / 64 MiB physical VMEM).
    vmem_budget = 16 * 1024 * 1024
    max_tm_vmem = max(
        row_align,
        (vmem_budget // (2 * demb * itemsize)) // row_align * row_align)
    tm = min(row_tile, max_tm_vmem)
    # Guarantee >= 2 grid steps so the "parallel" row axis can be split across
    # the two TensorCores on v7x (no effect on single-TC v5e/v6e).
    if klen > 16:
        tm = min(tm, _round_up(pl.cdiv(klen, 2), row_align))
    tm = max(row_align, (tm // row_align) * row_align)
    return tm


def positional_embedding(pos_seq, inv_freq, bsz=None, *, out_dtype=None,
                         row_tile=2048):
    """pos_seq: (klen,), inv_freq: (demb//2,) -> (klen, [bsz or 1,] demb)."""
    klen = pos_seq.shape[0]
    half = inv_freq.shape[0]
    demb = 2 * half
    if out_dtype is None:
        # Match torch: result dtype follows the (promoted) input dtypes.
        out_dtype = jnp.result_type(pos_seq.dtype, inv_freq.dtype)

    if demb < 128 or half % 128 != 0:
        # Sub-lane-dense output width would force masked partial stores; the
        # Pallas kernel should not be used in this regime — plain JAX instead.
        sinusoid = (pos_seq.astype(jnp.float32)[:, None]
                    * inv_freq.astype(jnp.float32)[None, :])
        pos_emb = jnp.concatenate(
            [jnp.sin(sinusoid), jnp.cos(sinusoid)], axis=-1).astype(out_dtype)
    else:
        tm = _select_row_tile(klen, demb, out_dtype, row_tile)
        grid = (pl.cdiv(klen, tm),)

        pos2d = pos_seq.astype(jnp.float32).reshape(klen, 1)
        inv2d = inv_freq.astype(jnp.float32).reshape(1, half)

        pos_emb = pl.pallas_call(
            functools.partial(_pos_emb_kernel, half=half),
            grid=grid,
            in_specs=[
                pl.BlockSpec((tm, 1), lambda i: (i, 0)),    # positions (row tile)
                pl.BlockSpec((1, half), lambda i: (0, 0)),  # inv_freq (replicated)
            ],
            out_specs=pl.BlockSpec((tm, demb), lambda i: (i, 0)),
            out_shape=jax.ShapeDtypeStruct((klen, demb), out_dtype),
            compiler_params=pltpu.CompilerParams(
                dimension_semantics=("parallel",)),
        )(pos2d, inv2d)

    if bsz is not None:
        # torch: pos_emb[:, None, :].expand(-1, bsz, -1)  (no data copy)
        return jnp.broadcast_to(pos_emb[:, None, :], (klen, bsz, demb))
    return pos_emb[:, None, :]


def make_inv_freq(demb, dtype=jnp.float32):
    # inv_freq = 1 / 10000 ** (arange(0, demb, 2) / demb)
    return (1.0 / (10000.0 ** (jnp.arange(0.0, demb, 2.0, dtype=jnp.float32)
                               / demb))).astype(dtype)


# ----------------------------------------------------------------------------
if __name__ == "__main__":
    key = jax.random.PRNGKey(0)

    def ref_fn(pos_seq, inv_freq, bsz):
        s = (pos_seq.astype(jnp.float32)[:, None]
             * inv_freq.astype(jnp.float32)[None, :])
        pe = jnp.concatenate([jnp.sin(s), jnp.cos(s)], axis=-1)
        if bsz is None:
            return pe[:, None, :]
        return jnp.broadcast_to(pe[:, None, :], (pe.shape[0], bsz, pe.shape[1]))

    # --- Pallas path: lane-dense demb, small klen ---------------------------
    demb, klen, bsz = 256, 8, 2
    pos_seq = (jnp.arange(klen - 1, -1, -1, dtype=jnp.float32)
               + jax.random.uniform(key, (klen,), jnp.float32))
    inv_freq = make_inv_freq(demb)

    out = jax.block_until_ready(positional_embedding(pos_seq, inv_freq, bsz=bsz))
    ref = ref_fn(pos_seq, inv_freq, bsz)
    assert out.shape == (klen, bsz, demb)
    assert jnp.all(jnp.isfinite(out))
    assert jnp.allclose(out, ref, atol=1e-6, rtol=1e-6)

    # --- Pallas path: multi-step grid + partial (masked) tail tile ----------
    klen2 = 40
    pos_seq2 = jnp.arange(klen2 - 1, -1, -1, dtype=jnp.float32)
    out2 = jax.block_until_ready(positional_embedding(pos_seq2, inv_freq))
    ref2 = ref_fn(pos_seq2, inv_freq, None)
    assert out2.shape == (klen2, 1, demb)
    assert jnp.allclose(out2, ref2, atol=1e-6, rtol=1e-6)

    # --- bf16 output path (halves HBM write traffic) ------------------------
    out_bf16 = jax.block_until_ready(
        positional_embedding(pos_seq, inv_freq, bsz=bsz, out_dtype=jnp.bfloat16))
    assert out_bf16.dtype == jnp.bfloat16
    assert jnp.allclose(out_bf16.astype(jnp.float32), ref, atol=1e-2, rtol=1e-2)

    # --- small-demb fallback (plain JAX, demb=32) ----------------------------
    demb_small = 32
    inv_small = make_inv_freq(demb_small)
    out_small = jax.block_until_ready(
        positional_embedding(pos_seq, inv_small, bsz=bsz))
    ref_small = ref_fn(pos_seq, inv_small, bsz)
    assert out_small.shape == (klen, bsz, demb_small)
    assert jnp.allclose(out_small, ref_small, atol=1e-6, rtol=1e-6)

    print("KERNEL_OK")
</pallas_src>

<mosaic_0001>
module attributes {stable_mosaic.version = 11 : i64} {
  func.func @_pos_emb_kernel(%arg0: i32, %arg1: memref<8x1xf32, #tpu.memory_space<vmem>>, %arg2: memref<1x128xf32, #tpu.memory_space<vmem>>, %arg3: memref<8x256xf32, #tpu.memory_space<vmem>>) attributes {dimension_semantics = [#tpu.dimension_semantics<parallel>], iteration_bounds = array<i64: 1>, scalar_prefetch = 0 : i64, scratch_operands = 0 : i64, tpu.core_type = #tpu.core_type<tc>, window_params = [{transform_indices = @transform_0, window_bounds = array<i64: 8, 1>}, {pipeline_mode = #tpu.pipeline_mode<synchronous>, transform_indices = @transform_1, window_bounds = array<i64: 1, 128>}, {transform_indices = @transform_2, window_bounds = array<i64: 8, 256>}]} {
    %c0 = arith.constant 0 : index
    %c0_0 = arith.constant 0 : index
    %0 = vector.load %arg1[%c0, %c0_0] : memref<8x1xf32, #tpu.memory_space<vmem>>, vector<8x1xf32>
    %c0_1 = arith.constant 0 : index
    %c0_2 = arith.constant 0 : index
    %1 = vector.load %arg2[%c0_1, %c0_2] : memref<1x128xf32, #tpu.memory_space<vmem>>, vector<1x128xf32>
    %2 = vector.broadcast %0 : vector<8x1xf32> to vector<8x128xf32>
    %3 = vector.broadcast %1 : vector<1x128xf32> to vector<8x128xf32>
    %4 = arith.mulf %2, %3 : vector<8x128xf32>
    %5 = math.sin %4 : vector<8x128xf32>
    %c0_3 = arith.constant 0 : index
    %c0_4 = arith.constant 0 : index
    %6 = vector.load %arg3[%c0_3, %c0_4] : memref<8x256xf32, #tpu.memory_space<vmem>>, vector<8x128xf32>
    tpu.vector_store %arg3[%c0_3, %c0_4], %5 {strides = array<i32>} : memref<8x256xf32, #tpu.memory_space<vmem>>, vector<8x128xf32>,
    %7 = math.cos %4 : vector<8x128xf32>
    %c0_5 = arith.constant 0 : index
    %c128 = arith.constant 128 : index
    %8 = vector.load %arg3[%c0_5, %c128] : memref<8x256xf32, #tpu.memory_space<vmem>>, vector<8x128xf32>
    tpu.vector_store %arg3[%c0_5, %c128], %7 {strides = array<i32>} : memref<8x256xf32, #tpu.memory_space<vmem>>, vector<8x128xf32>,
    return
  }
  func.func @transform_0(%arg0: i32) -> (i32, i32) {
    %c0_i32 = arith.constant 0 : i32
    %c0_i32_0 = arith.constant 0 : i32
    return %arg0, %c0_i32 : i32, i32
  }
  func.func @transform_1(%arg0: i32) -> (i32, i32) {
    %c0_i32 = arith.constant 0 : i32
    %c0_i32_0 = arith.constant 0 : i32
    %c0_i32_1 = arith.constant 0 : i32
    return %c0_i32, %c0_i32_0 : i32, i32
  }
  func.func @transform_2(%arg0: i32) -> (i32, i32) {
    %c0_i32 = arith.constant 0 : i32
    %c0_i32_0 = arith.constant 0 : i32
    return %arg0, %c0_i32 : i32, i32
  }
}

</mosaic_0001>

<bundles_post_ra>
// kernel: tpu_custom_call.1
= control target key start
LH: loop header
LB: loop body
LE: loop exit
PB: predicated region body
PF: predicated region fallthrough
CT: control target
= control target key end

     0   :  { %v297_v1 = vmov 0   ;;  %s350_s0 = inlined_call_operand.vmem [shape: f32[8,1], index: 0, kind: input, shape index: {}]   ;;  %s351_s1 = inlined_call_operand.vmem [shape: f32[1,128], index: 1, kind: input, shape index: {}]   ;;  %s352_s2 = inlined_call_operand.hbm [shape: f32[8,256], index: 2, kind: output, shape index: {}]  }
   0x1   :  { %v12_v0 = vld [vmem:[%s350_s0] sm:$0xff]  ;;  %270 = vset.pattern.permute.xlu0 %v297_v1 }
   0x2   :  { %16 = vperm.xlu0 %270, %v12_v0  }
   0x3   :  { %7 = vsyncpa [#allocation3], 0  ;;  %v249_v2 = vld [vmem:[%s351_s1] ss:$0 sm:$0xff]  ;;  %v298_v15 = vmov 683565275  }
   0x4   :  { %v299_v17 = vmov 2475754826   ;;  %v300_v20 = vmov 2131351028   ;;  %v301_v23 = vmov 2102212464  }
   0x5   :  { %v302_v26 = vmov 920167782   ;;  %v303_v29 = vmov 1326507024   ;;  %s304_s0 = smov [#allocation2]  }
   0x6   :  { %s241_s1 = sshll.u32 %s304_s0, 4  ;;  %s242_s1 = int_to_ptr.vmem [resolvable:$true] %s241_s1 }
   0x7   :  { %s275_s13 = scalar_lea.vmem %s242_s1, 256  ;;  %p280_p1 = scmp.lt.s32.totalorder %s242_s1, %s242_s1 }
   0x8   :  { %p276_p0 = scmp.ne.s32.totalorder %s242_s1, %s275_s13  ;;  %p281_p2 = scmp.lt.s32.totalorder %s275_s13, %s275_s13 }
   0xa   :  { %p282_p3 = por %p281_p2, %p280_p1 }
   0xc   :  { %p283_p4 = pnand %p282_p3, %p276_p0 }
  0x7d   :  { %v17_v3 = vpop.permute.xlu0 %16 }
  0x7e   :  { %v326_v4 = vmul.f32 %v249_v2, %v17_v3 }
  0x80   :  { %v29_v5 = vand.u32 2139095040, %v326_v4  ;;  %v26_v9 = vand.u32 2147483647, %v326_v4  ;;  %vm28_vm7 = vcmp.lt.s32.totalorder %v326_v4, 0  ;;  %vm118_vm15 = vweird.f32 %v326_v4 }
  0x82   :  { %v30_v6 = vshrl.u32 %v29_v5, 23  ;;  %v33_v12 = vand.u32 8388607, %v26_v9  ;;  %vm27_vm8 = vcmp.le.f32.partialorder %v26_v9, 0.7853982 }
  0x84   :  { %v250_v7 = vadd.s32 4294967169, %v30_v6  ;;  %v34_v31 = vor.u32 8388608, %v33_v12 }
  0x86   :  { %v36_v8 = vadd.s32 1, %v250_v7  ;;  %v74_v45 = vshll.u32 %v34_v31, 8 }
  0x88   :  { %vm37_vm0 = vcmp.gt.s32.totalorder %v36_v8, 0 }
  0x89   :  { %v38_v10 = vsel %vm37_vm0, %v36_v8, 0 }
  0x8a   :  { %v40_v11 = vand.u32 31, %v38_v10  ;;  %v39_v14 = vshrl.u32 %v38_v10, 5 }
  0x8c   :  { %v41_v13 = vsub.s32 32, %v40_v11  ;;  %v43_v16 = vshll.u32 %v298_v15, %v40_v11  ;;  %v46_v18 = vshll.u32 %v299_v17, %v40_v11  ;;  %v49_v22 = vshll.u32 %v300_v20, %v40_v11 }
  0x8d   :  { %v52_v25 = vshll.u32 %v301_v23, %v40_v11  ;;  %v55_v28 = vshll.u32 %v302_v26, %v40_v11  ;;  %vm58_vm1 = vcmp.lt.s32.totalorder %v39_v14, 1  ;;  %vm61_vm2 = vcmp.lt.s32.totalorder %v39_v14, 4 }
  0x8e   :  { %v44_v19 = vshrl.u32 %v299_v17, %v41_v13  ;;  %v47_v21 = vshrl.u32 %v300_v20, %v41_v13  ;;  %v50_v24 = vshrl.u32 %v301_v23, %v41_v13  ;;  %v53_v27 = vshrl.u32 %v302_v26, %v41_v13 }
  0x8f   :  { %v56_v30 = vshrl.u32 %v303_v29, %v41_v13  ;;  %v42_v40 = vshrl.u32 %v298_v15, %v41_v13  ;;  %vm60_vm3 = vcmp.lt.s32.totalorder %v39_v14, 3  ;;  %vm59_vm4 = vcmp.lt.s32.totalorder %v39_v14, 2 }
  0x90   :  { %v45_v32 = vor.u32 %v44_v19, %v43_v16  ;;  %v48_v33 = vor.u32 %v47_v21, %v46_v18  ;;  %v51_v34 = vor.u32 %v50_v24, %v49_v22  ;;  %v54_v35 = vor.u32 %v53_v27, %v52_v25 }
  0x91   :  { %v57_v36 = vor.u32 %v56_v30, %v55_v28 }
  0x92   :  { %v63_v37 = vsel %vm61_vm2, %v51_v34, 2102212464  ;;  %v66_v38 = vsel %vm58_vm1, %v45_v32, %v48_v33  ;;  %v70_v39 = vsel %vm58_vm1, %v48_v33, %v51_v34  ;;  %v67_v41 = vsel %vm61_vm2, %v54_v35, 920167782 }
  0x93   :  { %v71_v42 = vsel %vm61_vm2, %v57_v36, 1326507024  ;;  %v68_v43 = vsel %vm60_vm3, %v51_v34, %v67_v41  ;;  %v62_v46 = vsel %vm58_vm1, %v42_v40, %v45_v32  ;;  %v64_v47 = vsel %vm60_vm3, %v48_v33, %v63_v37 }
  0x94   :  { %v72_v44 = vsel %vm60_vm3, %v54_v35, %v71_v42  ;;  %v69_v48 = vsel %vm59_vm4, %v66_v38, %v68_v43  ;;  %v65_v54 = vsel %vm59_vm4, %v62_v46, %v64_v47 }
  0x95   :  { %v73_v49 = vsel %vm59_vm4, %v70_v39, %v72_v44  ;;  %v335_v52 = vmul.u32.u64.low %v74_v45, %v69_v48  ;;  %v336_v53 = vmul.u32.u64.high %v74_v45, %v69_v48, %v335_v52  ;;  %v81_v56 = vmul.u32 %v74_v45, %v65_v54 }
  0x96   :  { %v332_v50 = vmul.u32.u64.low %v74_v45, %v73_v49  ;;  %v333_v51 = vmul.u32.u64.high %v74_v45, %v73_v49, %v332_v50 }
  0x97   :  { %v84_v55 = vadd.s32 1, %v336_v53 }
  0x98   :  { %vm83_vm5 = vc.u32 %v333_v51, %v335_v52  ;;  %v82_v5 = vadd.s32 %v335_v52, %v333_v51 }
  0x99   :  { %v85_v57 = vsel %vm83_vm5, %v84_v55, %v336_v53 }
  0x9a   :  { %v86_v58 = vadd.s32 %v85_v57, %v81_v56 }
  0x9c   :  { %v87_v59 = vadd.s32 536870912, %v86_v58 }
  0x9e   :  { %v88_v60 = vshrl.u32 %v87_v59, 30 }
  0xa0   :  { %v89_v61 = vshll.u32 %v88_v60, 30  ;;  %v112_v19 = vsub.s32 4, %v88_v60 }
  0xa2   :  { %v90_v62 = vsub.s32 %v86_v58, %v89_v61  ;;  %v113_v22 = vsel %vm28_vm7, %v112_v19, %v88_v60 }
  0xa3   :  { %v115_v23 = vsel %vm27_vm8, 0, %v113_v22 }
  0xa4   :  { %v92_v63 = vsub.s32 0, %v90_v62  ;;  %v119_v24 = vadd.s32 3, %v115_v23  ;;  %v224_v26 = vand.u32 3, %v115_v23 }
  0xa6   :  { %v251_v0 = vmin.u32 %v92_v63, %v90_v62  ;;  %v120_v25 = vand.u32 3, %v119_v24  ;;  %vm229_vm10 = vcmp.eq.s32.totalorder %v224_v26, 2  ;;  %vm226_vm12 = vcmp.eq.s32.totalorder %v224_v26, 0 }
  0xa7   :  { %vm225_vm14 = vcmp.lt.s32.totalorder %v224_v26, 2 }
  0xa8   :  { %v94_v1 = vclz %v251_v0  ;;  %vm125_vm9 = vcmp.eq.s32.totalorder %v120_v25, 2  ;;  %vm122_vm11 = vcmp.eq.s32.totalorder %v120_v25, 0  ;;  %vm121_vm13 = vcmp.lt.s32.totalorder %v120_v25, 2 }
  0xaa   :  { %v252_v2 = vadd.s32 4294967294, %v94_v1 }
  0xac   :  { %vm253_vm6 = vcmp.lt.s32.totalorder %v252_v2, 0 }
  0xad   :  { %v97_v3 = vsel %vm253_vm6, 0, %v252_v2 }
  0xae   :  { %v98_v6 = vsub.s32 32, %v97_v3  ;;  %v102_v7 = vsub.s32 4294967266, %v97_v3  ;;  %v99_v8 = vshll.u32 %v90_v62, %v97_v3 }
  0xb0   :  { %v100_v10 = vshrl.u32 %v82_v5, %v98_v6  ;;  %v103_v11 = vadd.s32 127, %v102_v7 }
  0xb2   :  { %v101_v12 = vor.u32 %v100_v10, %v99_v8  ;;  %v104_v13 = vshll.u32 %v103_v11, 23 }
  0xb4   :  { %v105_v14 = vor.u32 4788187, %v104_v13  ;;  %v108_v16 = vcvt.s32.f32 %v101_v12 }
  0xb6   :  { %v106_v15 = vand.u32 2147483647, %v105_v14 }
  0xb8   :  { %v109_v17 = vmul.f32 %v108_v16, %v106_v15 }
  0xba   :  { %v110_v18 = vxor.u32 2147483648, %v109_v17 }
  0xbc   :  { %v111_v20 = vsel %vm28_vm7, %v110_v18, %v109_v17 }
  0xbd   :  { %v114_v21 = vsel %vm27_vm8, %v326_v4, %v111_v20 }
  0xbe   :  { %271 = vcosq.f32 %v114_v21 }
  0xbf   :  { %273 = vsinq.f32 %v114_v21 }
  0xcb   :  { %v272_v27 = vpop.eup %271 }
  0xcc   :  { %v274_v28 = vpop.eup %273  ;;  %v126_v29 = vxor.u32 2147483648, %v272_v27 }
  0xcd   :  { %v123_v30 = vxor.u32 2147483648, %v274_v28 }
  0xce   :  { %v127_v9 = vsel %vm125_vm9, %v126_v29, %v274_v28  ;;  %v231_v31 = vsel %vm229_vm10, %v126_v29, %v274_v28 }
  0xcf   :  { %v124_v32 = vsel %vm122_vm11, %v272_v27, %v123_v30  ;;  %v228_v33 = vsel %vm226_vm12, %v272_v27, %v123_v30 }
  0xd0   :  { %v128_v34 = vsel %vm121_vm13, %v124_v32, %v127_v9  ;;  %v232_v35 = vsel %vm225_vm14, %v228_v33, %v231_v31 }
  0xd1   :  { %v129_v36 = vsel %vm118_vm15, nan, %v128_v34  ;;  %v233_v37 = vsel %vm118_vm15, nan, %v232_v35 }
  0xd2   :  { %130 = vst [vmem:[#allocation2] sm:$0xff] %v129_v36  ;;  %234 = vst [vmem:[#allocation2 + $0x8] sm:$0xff] %v233_v37 }
  0xd3   :  { %286 = shalt.err (!%p283_p4)
}
  0xd4   :  { %244 = dma.vmem_to_hbm [thread:$0]  %s242_s1, 256, %s352_s2, [#allocation3]  }
  0xd5   :  { %295 = dma.done.wait [#allocation3], 256  }
  0xd6   :  { %296 = vsyncadd [#allocation3], 4294967040 }
  0xd7   :  { %248 = vsyncpa [#allocation3], 1 }

</bundles_post_ra>
